<compile_context>
chip_gen: v7x
topology: tpu7x:2x2x1
jax: 0.10.0
libtpu: 0.0.40
codegen_flags: <defaults>
</compile_context>

<pallas_src>
import functools

import jax
import jax.numpy as jnp
from jax.experimental import pallas as pl
from jax.experimental.pallas import tpu as pltpu

# ---- sizes implied by the PyTorch module -----------------------------------
# NIN = 38 + 38 + 1 + 19 + 1 + 38 + 1 = 136
NIN = 136
PHYSICS_LS = 128
NLCFS = 129
NOUT = 2 * NLCFS          # 258

LAYER_DIMS = [(NIN, 128), (128, 64), (64, PHYSICS_LS),
              (PHYSICS_LS, 32), (32, 32), (32, NOUT)]

TILE_UNIT = 16            # bf16 sublane packing for the streamed x/out blocks


def _round_up(n, m):
    return ((n + m - 1) // m) * m


# ---- Pallas kernel: one batch tile of the full 6-layer MLP ------------------
def lcfsnet_kernel(x_ref,
                   w1, b1, w2, b2, w3, b3, w4, b4, w5, b5, w6, b6,
                   beta_last_ref, out_ref):
    """x is bf16, weights are bf16 (halved DMA / MXU-native); accumulation and
    all element-wise math stays f32 (v5e-safe).  Input normalization and the
    first four ActF betas are folded into the weights; the last ActF's beta is
    a single SMEM scalar.  Output is stored as bf16, exactly NOUT wide."""

    def dense(h, w_ref, b_ref):
        if h.dtype != jnp.bfloat16:
            h = h.astype(jnp.bfloat16)
        z = jnp.dot(h, w_ref[...], preferred_element_type=jnp.float32)
        return z + b_ref[...]

    def swish(h):                       # canonical swish (betas already folded)
        return h * jax.nn.sigmoid(h)

    x = x_ref[...]                                    # (TILE_B, NIN) bf16

    # InputNet: Linear(136,128) -> ActF -> Linear(128,64) -> ActF
    #           -> Linear(64,128) -> Tanh
    h = swish(dense(x, w1, b1))
    h = swish(dense(h, w2, b2))
    ph = jnp.tanh(dense(h, w3, b3))

    # LCFSHead: Linear(128,32) -> ActF -> Linear(32,32) -> ActF
    #           -> Linear(32,258) -> ActF (explicit last beta)
    g = swish(dense(ph, w4, b4))
    g = swish(dense(g, w5, b5))
    z = dense(g, w6, b6)
    beta = beta_last_ref[0]
    out_ref[...] = (z * jax.nn.sigmoid(beta * z)).astype(out_ref.dtype)


# ---- one-time parameter transform (offline folding) -------------------------
def prepare_params(raw_params):
    """Fold (x-mean)/std into layer 1, fold betas[0:4] into the weights
    (beta_i scales layer i; 1/beta_i is absorbed by layer i+1), keep the last
    ActF beta as a (1,) scalar, and cast weights to bf16.  Done once offline.

    Note: folding 1/std (and beta ratios) before the bf16 cast can amplify
    quantization error if std has tiny entries; keep layer-1 in f32 in that
    case (not needed for this synthetic parameterisation)."""
    (mean, std, w1, b1, w2, b2, w3, b3, w4, b4, w5, b5, w6, b6, betas) = raw_params

    # ((x - mean)/std) @ W1 + b1  ==  x @ (W1/std^T) + (b1 - (mean/std) @ W1)
    w1n = w1 / std.reshape(NIN, 1)
    b1n = b1 - (mean / std) @ w1

    beta = betas
    w1f = beta[0] * w1n;             b1f = beta[0] * b1n
    w2f = (beta[1] / beta[0]) * w2;  b2f = beta[1] * b2
    w3f = w3 / beta[1];              b3f = b3           # tanh layer, no beta
    w4f = beta[2] * w4;              b4f = beta[2] * b4
    w5f = (beta[3] / beta[2]) * w5;  b5f = beta[3] * b5
    w6f = w6 / beta[3];              b6f = b6
    beta_last = betas[4:5].astype(jnp.float32)          # last ActF stays explicit

    ws = [w1f, w2f, w3f, w4f, w5f, w6f]
    bs = [b1f, b2f, b3f, b4f, b5f, b6f]
    prepared = []
    for w, b in zip(ws, bs):
        prepared.append(w.astype(jnp.bfloat16))   # bf16 weights, f32 accum in-kernel
        prepared.append(b.astype(jnp.float32))
    prepared.append(beta_last)                     # SMEM scalar
    return tuple(prepared)


# ---- tile selection ----------------------------------------------------------
def _choose_tile_b(B, max_tile_b):
    """Multiple of TILE_UNIT, >= 2 grid steps when there is enough work (v7x
    has 2 TensorCores), and small tail-padding waste."""
    b_unit = _round_up(B, TILE_UNIT)
    cap = b_unit // 2 if b_unit >= 2 * TILE_UNIT else b_unit
    tile = min((max_tile_b // TILE_UNIT) * TILE_UNIT,
               (cap // TILE_UNIT) * TILE_UNIT)
    tile = max(TILE_UNIT, tile)
    # shrink while the tail padding is a significant fraction of the work
    while tile > TILE_UNIT and (_round_up(B, tile) - b_unit) > max(TILE_UNIT, b_unit // 8):
        tile = max(TILE_UNIT, ((tile // 2) // TILE_UNIT) * TILE_UNIT)
    return tile


# ---- wrapper ----------------------------------------------------------------
@functools.partial(jax.jit, static_argnames=("max_tile_b",))
def lcfsnet_forward(x, prepared_params, max_tile_b=512):
    B = x.shape[0]
    if x.dtype != jnp.bfloat16:
        # In production keep inputs stored in bf16 to skip this extra pass.
        x = x.astype(jnp.bfloat16)

    tile_b = _choose_tile_b(B, max_tile_b)
    b_pad = _round_up(B, tile_b)
    if b_pad != B:
        x = jnp.pad(x, ((0, b_pad - B), (0, 0)))   # small row-only tail pad
    grid = (b_pad // tile_b,)

    weight_bias = prepared_params[:-1]
    beta_last = prepared_params[-1]

    in_specs = [pl.BlockSpec((tile_b, NIN), lambda i: (i, 0))]        # x: streamed
    for p in weight_bias:                                             # weights: pinned
        in_specs.append(pl.BlockSpec(p.shape, lambda i: (0, 0)))
    in_specs.append(pl.BlockSpec(memory_space=pltpu.MemorySpace.SMEM))  # last beta

    out_specs = pl.BlockSpec((tile_b, NOUT), lambda i: (i, 0))        # bf16, 258 wide

    # Roofline hint: ~94 KFLOP, ~642 transcendentals, ~0.8 KB of HBM per row.
    flops = 2 * b_pad * sum(din * dout for din, dout in LAYER_DIMS)
    transcendentals = b_pad * (128 + 64 + 128 + 32 + 32 + NOUT)
    weight_bytes = sum(int(p.size) * p.dtype.itemsize for p in weight_bias)
    bytes_accessed = b_pad * (NIN * 2 + NOUT * 2) + weight_bytes

    # Explicit VMEM budget (matters on v5e's 16 MiB scoped default for big tiles).
    stream_bytes = tile_b * (NIN * 2 + NOUT * 2 + 642 * 4)
    vmem_limit = int(min(48 << 20, max(16 << 20, 4 * stream_bytes + 4 * weight_bytes)))

    out = pl.pallas_call(
        lcfsnet_kernel,
        grid=grid,
        out_shape=jax.ShapeDtypeStruct((b_pad, NOUT), jnp.bfloat16),
        in_specs=in_specs,
        out_specs=out_specs,
        compiler_params=pltpu.CompilerParams(
            dimension_semantics=("parallel",),
            vmem_limit_bytes=vmem_limit),
        cost_estimate=pl.CostEstimate(flops=int(flops),
                                      transcendentals=int(transcendentals),
                                      bytes_accessed=int(bytes_accessed)),
    )(x, *weight_bias, beta_last)

    # Row slice is a no-op when B is already a tile multiple (no pad case);
    # columns are exactly NOUT, so no column slice / extra HBM pass.
    return out[:B]


# ---- deterministic parameter init (synthetic, not a checkpoint) --------------
def init_raw_params(key):
    keys = jax.random.split(key, 2 * len(LAYER_DIMS) + 2)
    mean = 0.1 * jax.random.normal(keys[-2], (1, NIN), jnp.float32)
    std = jax.random.uniform(keys[-1], (1, NIN), jnp.float32,
                             minval=0.5, maxval=1.5)
    params = [mean, std]
    for i, (din, dout) in enumerate(LAYER_DIMS):
        w = 0.05 * jax.random.normal(keys[2 * i], (din, dout), jnp.float32)
        b = 0.05 * jax.random.normal(keys[2 * i + 1], (1, dout), jnp.float32)
        params += [w, b]
    # 5 ActF beta scalars (module inits them to 1.0; non-trivial values here
    # to exercise the beta-folding path)
    params.append(jnp.array([1.0, 1.1, 0.9, 1.05, 0.95], jnp.float32))
    return tuple(params)


# ---- pure-JAX reference (original module semantics, f32) ---------------------
def lcfsnet_ref(x, raw_params):
    (mean, std, w1, b1, w2, b2, w3, b3, w4, b4, w5, b5, w6, b6, betas) = raw_params
    swish = lambda h, beta: h * jax.nn.sigmoid(beta * h)
    h = (x - mean) / std
    h = swish(h @ w1 + b1, betas[0])
    h = swish(h @ w2 + b2, betas[1])
    ph = jnp.tanh(h @ w3 + b3)
    g = swish(ph @ w4 + b4, betas[2])
    g = swish(g @ w5 + b5, betas[3])
    return swish(g @ w6 + b6, betas[4])


if __name__ == "__main__":
    key = jax.random.PRNGKey(0)
    kx, kp = jax.random.split(key)
    B = 32                              # small demo batch -> 2 grid steps of 16
    x = jax.random.normal(kx, (B, NIN), jnp.float32)
    raw = init_raw_params(kp)
    prepared = prepare_params(raw)

    out = lcfsnet_forward(x, prepared)
    out = jax.block_until_ready(out)

    ref = lcfsnet_ref(x, raw)
    assert out.shape == (B, NOUT), out.shape
    out_f32 = out.astype(jnp.float32)
    max_err = float(jnp.max(jnp.abs(out_f32 - ref)))
    # bf16 input/output streams + bf16 weights with f32 accumulation.
    assert jnp.allclose(out_f32, ref, atol=5e-2, rtol=5e-2), f"max abs err {max_err}"
    print("KERNEL_OK")
</pallas_src>

<mosaic_0001>
module attributes {stable_mosaic.version = 11 : i64} {
  func.func @lcfsnet_kernel(%arg0: i32, %arg1: memref<16x136xbf16, #tpu.memory_space<vmem>>, %arg2: memref<136x128xbf16, #tpu.memory_space<vmem>>, %arg3: memref<1x128xf32, #tpu.memory_space<vmem>>, %arg4: memref<128x64xbf16, #tpu.memory_space<vmem>>, %arg5: memref<1x64xf32, #tpu.memory_space<vmem>>, %arg6: memref<64x128xbf16, #tpu.memory_space<vmem>>, %arg7: memref<1x128xf32, #tpu.memory_space<vmem>>, %arg8: memref<128x32xbf16, #tpu.memory_space<vmem>>, %arg9: memref<1x32xf32, #tpu.memory_space<vmem>>, %arg10: memref<32x32xbf16, #tpu.memory_space<vmem>>, %arg11: memref<1x32xf32, #tpu.memory_space<vmem>>, %arg12: memref<32x258xbf16, #tpu.memory_space<vmem>>, %arg13: memref<1x258xf32, #tpu.memory_space<vmem>>, %arg14: memref<1xf32, #tpu.memory_space<smem>>, %arg15: memref<16x258xbf16, #tpu.memory_space<vmem>>) attributes {dimension_semantics = [#tpu.dimension_semantics<parallel>], iteration_bounds = array<i64: 2>, scalar_prefetch = 0 : i64, scratch_operands = 0 : i64, tpu.core_type = #tpu.core_type<tc>, window_params = [{transform_indices = @transform_0, window_bounds = array<i64: 16, 136>}, {pipeline_mode = #tpu.pipeline_mode<synchronous>, transform_indices = @transform_1, window_bounds = array<i64: 136, 128>}, {pipeline_mode = #tpu.pipeline_mode<synchronous>, transform_indices = @transform_2, window_bounds = array<i64: 1, 128>}, {pipeline_mode = #tpu.pipeline_mode<synchronous>, transform_indices = @transform_3, window_bounds = array<i64: 128, 64>}, {pipeline_mode = #tpu.pipeline_mode<synchronous>, transform_indices = @transform_4, window_bounds = array<i64: 1, 64>}, {pipeline_mode = #tpu.pipeline_mode<synchronous>, transform_indices = @transform_5, window_bounds = array<i64: 64, 128>}, {pipeline_mode = #tpu.pipeline_mode<synchronous>, transform_indices = @transform_6, window_bounds = array<i64: 1, 128>}, {pipeline_mode = #tpu.pipeline_mode<synchronous>, transform_indices = @transform_7, window_bounds = array<i64: 128, 32>}, {pipeline_mode = #tpu.pipeline_mode<synchronous>, transform_indices = @transform_8, window_bounds = array<i64: 1, 32>}, {pipeline_mode = #tpu.pipeline_mode<synchronous>, transform_indices = @transform_9, window_bounds = array<i64: 32, 32>}, {pipeline_mode = #tpu.pipeline_mode<synchronous>, transform_indices = @transform_10, window_bounds = array<i64: 1, 32>}, {pipeline_mode = #tpu.pipeline_mode<synchronous>, transform_indices = @transform_11, window_bounds = array<i64: 32, 258>}, {pipeline_mode = #tpu.pipeline_mode<synchronous>, transform_indices = @transform_12, window_bounds = array<i64: 1, 258>}, {transform_indices = @transform_13, window_bounds = array<i64: 1>}, {transform_indices = @transform_14, window_bounds = array<i64: 16, 258>}]} {
    %c0 = arith.constant 0 : index
    %c0_0 = arith.constant 0 : index
    %0 = vector.load %arg1[%c0, %c0_0] : memref<16x136xbf16, #tpu.memory_space<vmem>>, vector<16x136xbf16>
    %c0_1 = arith.constant 0 : index
    %c0_2 = arith.constant 0 : index
    %1 = vector.load %arg2[%c0_1, %c0_2] : memref<136x128xbf16, #tpu.memory_space<vmem>>, vector<136x128xbf16>
    %cst = arith.constant dense<0.000000e+00> : vector<16x128xf32>
    %2 = tpu.matmul %0, %1, %cst {dimension_numbers = #tpu.dot_dimension_numbers<[1], [0], [0], [1], [0, 0, 1, 1], [], []>} : vector<16x136xbf16>, vector<136x128xbf16>, vector<16x128xf32> -> vector<16x128xf32>
    %c0_3 = arith.constant 0 : index
    %c0_4 = arith.constant 0 : index
    %3 = vector.load %arg3[%c0_3, %c0_4] : memref<1x128xf32, #tpu.memory_space<vmem>>, vector<1x128xf32>
    %4 = vector.broadcast %3 : vector<1x128xf32> to vector<16x128xf32>
    %5 = arith.addf %2, %4 : vector<16x128xf32>
    %6 = arith.negf %5 : vector<16x128xf32>
    %7 = math.exp %6 : vector<16x128xf32>
    %cst_5 = arith.constant 1.000000e+00 : f32
    %8 = vector.broadcast %cst_5 : f32 to vector<16x128xf32>
    %9 = arith.addf %8, %7 : vector<16x128xf32>
    %10 = arith.divf %8, %9 : vector<16x128xf32>
    %11 = arith.mulf %5, %10 : vector<16x128xf32>
    %12 = arith.truncf %11 : vector<16x128xf32> to vector<16x128xbf16>
    %c0_6 = arith.constant 0 : index
    %c0_7 = arith.constant 0 : index
    %13 = vector.load %arg4[%c0_6, %c0_7] : memref<128x64xbf16, #tpu.memory_space<vmem>>, vector<128x64xbf16>
    %cst_8 = arith.constant dense<0.000000e+00> : vector<16x64xf32>
    %14 = tpu.matmul %12, %13, %cst_8 {dimension_numbers = #tpu.dot_dimension_numbers<[1], [0], [0], [1], [0, 0, 1, 1], [], []>} : vector<16x128xbf16>, vector<128x64xbf16>, vector<16x64xf32> -> vector<16x64xf32>
    %c0_9 = arith.constant 0 : index
    %c0_10 = arith.constant 0 : index
    %15 = vector.load %arg5[%c0_9, %c0_10] : memref<1x64xf32, #tpu.memory_space<vmem>>, vector<1x64xf32>
    %16 = vector.broadcast %15 : vector<1x64xf32> to vector<16x64xf32>
    %17 = arith.addf %14, %16 : vector<16x64xf32>
    %18 = arith.negf %17 : vector<16x64xf32>
    %19 = math.exp %18 : vector<16x64xf32>
    %cst_11 = arith.constant 1.000000e+00 : f32
    %20 = vector.broadcast %cst_11 : f32 to vector<16x64xf32>
    %21 = arith.addf %20, %19 : vector<16x64xf32>
    %22 = arith.divf %20, %21 : vector<16x64xf32>
    %23 = arith.mulf %17, %22 : vector<16x64xf32>
    %24 = arith.truncf %23 : vector<16x64xf32> to vector<16x64xbf16>
    %c0_12 = arith.constant 0 : index
    %c0_13 = arith.constant 0 : index
    %25 = vector.load %arg6[%c0_12, %c0_13] : memref<64x128xbf16, #tpu.memory_space<vmem>>, vector<64x128xbf16>
    %cst_14 = arith.constant dense<0.000000e+00> : vector<16x128xf32>
    %26 = tpu.matmul %24, %25, %cst_14 {dimension_numbers = #tpu.dot_dimension_numbers<[1], [0], [0], [1], [0, 0, 1, 1], [], []>} : vector<16x64xbf16>, vector<64x128xbf16>, vector<16x128xf32> -> vector<16x128xf32>
    %c0_15 = arith.constant 0 : index
    %c0_16 = arith.constant 0 : index
    %27 = vector.load %arg7[%c0_15, %c0_16] : memref<1x128xf32, #tpu.memory_space<vmem>>, vector<1x128xf32>
    %28 = vector.broadcast %27 : vector<1x128xf32> to vector<16x128xf32>
    %29 = arith.addf %26, %28 : vector<16x128xf32>
    %30 = math.tanh %29 : vector<16x128xf32>
    %31 = arith.truncf %30 : vector<16x128xf32> to vector<16x128xbf16>
    %c0_17 = arith.constant 0 : index
    %c0_18 = arith.constant 0 : index
    %32 = vector.load %arg8[%c0_17, %c0_18] : memref<128x32xbf16, #tpu.memory_space<vmem>>, vector<128x32xbf16>
    %cst_19 = arith.constant dense<0.000000e+00> : vector<16x32xf32>
    %33 = tpu.matmul %31, %32, %cst_19 {dimension_numbers = #tpu.dot_dimension_numbers<[1], [0], [0], [1], [0, 0, 1, 1], [], []>} : vector<16x128xbf16>, vector<128x32xbf16>, vector<16x32xf32> -> vector<16x32xf32>
    %c0_20 = arith.constant 0 : index
    %c0_21 = arith.constant 0 : index
    %34 = vector.load %arg9[%c0_20, %c0_21] : memref<1x32xf32, #tpu.memory_space<vmem>>, vector<1x32xf32>
    %35 = vector.broadcast %34 : vector<1x32xf32> to vector<16x32xf32>
    %36 = arith.addf %33, %35 : vector<16x32xf32>
    %37 = arith.negf %36 : vector<16x32xf32>
    %38 = math.exp %37 : vector<16x32xf32>
    %cst_22 = arith.constant 1.000000e+00 : f32
    %39 = vector.broadcast %cst_22 : f32 to vector<16x32xf32>
    %40 = arith.addf %39, %38 : vector<16x32xf32>
    %41 = arith.divf %39, %40 : vector<16x32xf32>
    %42 = arith.mulf %36, %41 : vector<16x32xf32>
    %43 = arith.truncf %42 : vector<16x32xf32> to vector<16x32xbf16>
    %c0_23 = arith.constant 0 : index
    %c0_24 = arith.constant 0 : index
    %44 = vector.load %arg10[%c0_23, %c0_24] : memref<32x32xbf16, #tpu.memory_space<vmem>>, vector<32x32xbf16>
    %cst_25 = arith.constant dense<0.000000e+00> : vector<16x32xf32>
    %45 = tpu.matmul %43, %44, %cst_25 {dimension_numbers = #tpu.dot_dimension_numbers<[1], [0], [0], [1], [0, 0, 1, 1], [], []>} : vector<16x32xbf16>, vector<32x32xbf16>, vector<16x32xf32> -> vector<16x32xf32>
    %c0_26 = arith.constant 0 : index
    %c0_27 = arith.constant 0 : index
    %46 = vector.load %arg11[%c0_26, %c0_27] : memref<1x32xf32, #tpu.memory_space<vmem>>, vector<1x32xf32>
    %47 = vector.broadcast %46 : vector<1x32xf32> to vector<16x32xf32>
    %48 = arith.addf %45, %47 : vector<16x32xf32>
    %49 = arith.negf %48 : vector<16x32xf32>
    %50 = math.exp %49 : vector<16x32xf32>
    %cst_28 = arith.constant 1.000000e+00 : f32
    %51 = vector.broadcast %cst_28 : f32 to vector<16x32xf32>
    %52 = arith.addf %51, %50 : vector<16x32xf32>
    %53 = arith.divf %51, %52 : vector<16x32xf32>
    %54 = arith.mulf %48, %53 : vector<16x32xf32>
    %55 = arith.truncf %54 : vector<16x32xf32> to vector<16x32xbf16>
    %c0_29 = arith.constant 0 : index
    %c0_30 = arith.constant 0 : index
    %56 = vector.load %arg12[%c0_29, %c0_30] : memref<32x258xbf16, #tpu.memory_space<vmem>>, vector<32x258xbf16>
    %cst_31 = arith.constant dense<0.000000e+00> : vector<16x258xf32>
    %57 = tpu.matmul %55, %56, %cst_31 {dimension_numbers = #tpu.dot_dimension_numbers<[1], [0], [0], [1], [0, 0, 1, 1], [], []>} : vector<16x32xbf16>, vector<32x258xbf16>, vector<16x258xf32> -> vector<16x258xf32>
    %c0_32 = arith.constant 0 : index
    %c0_33 = arith.constant 0 : index
    %58 = vector.load %arg13[%c0_32, %c0_33] : memref<1x258xf32, #tpu.memory_space<vmem>>, vector<1x258xf32>
    %59 = vector.broadcast %58 : vector<1x258xf32> to vector<16x258xf32>
    %60 = arith.addf %57, %59 : vector<16x258xf32>
    %c0_34 = arith.constant 0 : index
    %61 = memref.load %arg14[%c0_34] : memref<1xf32, #tpu.memory_space<smem>>
    %62 = vector.broadcast %61 : f32 to vector<16x258xf32>
    %63 = arith.mulf %62, %60 : vector<16x258xf32>
    %64 = arith.negf %63 : vector<16x258xf32>
    %65 = math.exp %64 : vector<16x258xf32>
    %cst_35 = arith.constant 1.000000e+00 : f32
    %66 = vector.broadcast %cst_35 : f32 to vector<16x258xf32>
    %67 = arith.addf %66, %65 : vector<16x258xf32>
    %68 = arith.divf %66, %67 : vector<16x258xf32>
    %69 = arith.mulf %60, %68 : vector<16x258xf32>
    %70 = arith.truncf %69 : vector<16x258xf32> to vector<16x258xbf16>
    %c0_36 = arith.constant 0 : index
    %c0_37 = arith.constant 0 : index
    %71 = vector.load %arg15[%c0_36, %c0_37] : memref<16x258xbf16, #tpu.memory_space<vmem>>, vector<16x258xbf16>
    tpu.vector_store %arg15[%c0_36, %c0_37], %70 {strides = array<i32>} : memref<16x258xbf16, #tpu.memory_space<vmem>>, vector<16x258xbf16>,
    return
  }
  func.func @transform_0(%arg0: i32) -> (i32, i32) {
    %c0_i32 = arith.constant 0 : i32
    %c0_i32_0 = arith.constant 0 : i32
    return %arg0, %c0_i32 : i32, i32
  }
  func.func @transform_1(%arg0: i32) -> (i32, i32) {
    %c0_i32 = arith.constant 0 : i32
    %c0_i32_0 = arith.constant 0 : i32
    %c0_i32_1 = arith.constant 0 : i32
    return %c0_i32, %c0_i32_0 : i32, i32
  }
  func.func @transform_2(%arg0: i32) -> (i32, i32) {
    %c0_i32 = arith.constant 0 : i32
    %c0_i32_0 = arith.constant 0 : i32
    %c0_i32_1 = arith.constant 0 : i32
    return %c0_i32, %c0_i32_0 : i32, i32
  }
  func.func @transform_3(%arg0: i32) -> (i32, i32) {
    %c0_i32 = arith.constant 0 : i32
    %c0_i32_0 = arith.constant 0 : i32
    %c0_i32_1 = arith.constant 0 : i32
    return %c0_i32, %c0_i32_0 : i32, i32
  }
  func.func @transform_4(%arg0: i32) -> (i32, i32) {
    %c0_i32 = arith.constant 0 : i32
    %c0_i32_0 = arith.constant 0 : i32
    %c0_i32_1 = arith.constant 0 : i32
    return %c0_i32, %c0_i32_0 : i32, i32
  }
  func.func @transform_5(%arg0: i32) -> (i32, i32) {
    %c0_i32 = arith.constant 0 : i32
    %c0_i32_0 = arith.constant 0 : i32
    %c0_i32_1 = arith.constant 0 : i32
    return %c0_i32, %c0_i32_0 : i32, i32
  }
  func.func @transform_6(%arg0: i32) -> (i32, i32) {
    %c0_i32 = arith.constant 0 : i32
    %c0_i32_0 = arith.constant 0 : i32
    %c0_i32_1 = arith.constant 0 : i32
    return %c0_i32, %c0_i32_0 : i32, i32
  }
  func.func @transform_7(%arg0: i32) -> (i32, i32) {
    %c0_i32 = arith.constant 0 : i32
    %c0_i32_0 = arith.constant 0 : i32
    %c0_i32_1 = arith.constant 0 : i32
    return %c0_i32, %c0_i32_0 : i32, i32
  }
  func.func @transform_8(%arg0: i32) -> (i32, i32) {
    %c0_i32 = arith.constant 0 : i32
    %c0_i32_0 = arith.constant 0 : i32
    %c0_i32_1 = arith.constant 0 : i32
    return %c0_i32, %c0_i32_0 : i32, i32
  }
  func.func @transform_9(%arg0: i32) -> (i32, i32) {
    %c0_i32 = arith.constant 0 : i32
    %c0_i32_0 = arith.constant 0 : i32
    %c0_i32_1 = arith.constant 0 : i32
    return %c0_i32, %c0_i32_0 : i32, i32
  }
  func.func @transform_10(%arg0: i32) -> (i32, i32) {
    %c0_i32 = arith.constant 0 : i32
    %c0_i32_0 = arith.constant 0 : i32
    %c0_i32_1 = arith.constant 0 : i32
    return %c0_i32, %c0_i32_0 : i32, i32
  }
  func.func @transform_11(%arg0: i32) -> (i32, i32) {
    %c0_i32 = arith.constant 0 : i32
    %c0_i32_0 = arith.constant 0 : i32
    %c0_i32_1 = arith.constant 0 : i32
    return %c0_i32, %c0_i32_0 : i32, i32
  }
  func.func @transform_12(%arg0: i32) -> (i32, i32) {
    %c0_i32 = arith.constant 0 : i32
    %c0_i32_0 = arith.constant 0 : i32
    %c0_i32_1 = arith.constant 0 : i32
    return %c0_i32, %c0_i32_0 : i32, i32
  }
  func.func @transform_13(%arg0: i32) -> i32 {
    %c0_i32 = arith.constant 0 : i32
    %c0_i32_0 = arith.constant 0 : i32
    return %c0_i32 : i32
  }
  func.func @transform_14(%arg0: i32) -> (i32, i32) {
    %c0_i32 = arith.constant 0 : i32
    %c0_i32_0 = arith.constant 0 : i32
    return %arg0, %c0_i32 : i32, i32
  }
}

</mosaic_0001>

<bundles_post_ra>
// kernel: lcfsnet_forward.1
= control target key start
LH: loop header
LB: loop body
LE: loop exit
PB: predicated region body
PF: predicated region fallthrough
CT: control target
= control target key end

     0   :  { %s2103_s0 = inlined_call_operand.vmem [shape: bf16[32,136], index: 0, kind: input, shape index: {}]   ;;  %s2104_s1 = inlined_call_operand.vmem [shape: bf16[136,128], index: 1, kind: input, shape index: {}]   ;;  %s2105_s2 = inlined_call_operand.vmem [shape: f32[1,128], index: 2, kind: input, shape index: {}]   ;;  %s2106_s3 = inlined_call_operand.vmem [shape: bf16[128,64], index: 3, kind: input, shape index: {}]   ;;  %s2107_s4 = inlined_call_operand.vmem [shape: f32[1,64], index: 4, kind: input, shape index: {}]   ;;  %s2108_s5 = inlined_call_operand.vmem [shape: bf16[64,128], index: 5, kind: input, shape index: {}]   ;;  %s2109_s6 = inlined_call_operand.vmem [shape: f32[1,128], index: 6, kind: input, shape index: {}]   ;;  %s2110_s7 = inlined_call_operand.vmem [shape: bf16[128,32], index: 7, kind: input, shape index: {}]   ;;  %s2111_s8 = inlined_call_operand.vmem [shape: f32[1,32], index: 8, kind: input, shape index: {}]   ;;  %s2112_s9 = inlined_call_operand.vmem [shape: bf16[32,32], index: 9, kind: input, shape index: {}]   ;;  %s2113_s10 = inlined_call_operand.vmem [shape: f32[1,32], index: 10, kind: input, shape index: {}]   ;;  %s2114_s11 = inlined_call_operand.vmem [shape: bf16[32,258], index: 11, kind: input, shape index: {}]   ;;  %s2115_s12 = inlined_call_operand.vmem [shape: f32[1,258], index: 12, kind: input, shape index: {}]   ;;  %s2116_s13 = inlined_call_operand.<no memory space> [shape: f32[1], index: 13, kind: input, shape index: {}]   ;;  %s2117_s14 = inlined_call_operand.hbm [shape: bf16[32,258], index: 14, kind: output, shape index: {}]  }
   0x1   :  { %19 = sst [smem:[#allocation2]] %s2116_s13 }
   0x2   :  { %20 = vsyncpa [#allocation4], 0 }
   0x3   :  { %22 = vsyncpa [#allocation4 + $0x1], 0  ;;  %s1821_s15 = smov 0   ;;  %s1823_s16 = smov 0  }
   0x4   :  { %s1825_s17 = smov 0   ;;  %s1827_s18 = smov 0  }
   0x5 LB: > { %2121 = sst [smem:[#allocation6_spill]] %s1731_s17  ;;  %s1842_s13 = sadd.s32 4294967295, %s1735_s18   ;;  %s1735_s18 = sphi %s1827_s18, %s2126_s18   ;;  %s1731_s17 = sphi %s1825_s17, %s2131_s17   ;;  %s1727_s16 = sphi %s1823_s16, %s2130_s16   ;;  %s1723_s15 = sphi %s1821_s15, %s2129_s15  }
   0x6   : > { %s1344_s19 = sadd.s32 4294967294, %s1735_s18   ;;  %s1846_s20 = sadd.s32 1, %s1735_s18  }
   0x7   : > { %2122 = sst [smem:[#allocation7_spill]] %s1846_s20  ;;  %s334_s21 = sadd.s32 1, %s1731_s17 }
   0x8   : > { %s331_s22 = ssub.s32 %s1735_s18, %s1846_s20  ;;  %p344_p0 = scmp.ne.s32.totalorder %s1731_s17, %s1727_s16 }
   0x9   : > { %p332_p1 = scmp.eq.s32.totalorder %s331_s22, 0  ;;  %p345_p2 = scmp.eq.s32.totalorder %s1842_s13, 1 }
   0xa   : > { %p350_p3 = scmp.ne.s32.totalorder %s1727_s16, %s1723_s15  ;;  %p351_p4 = scmp.eq.s32.totalorder %s1344_s19, 1 }
   0xb   : > { %s1857_s23 = scalar_select %p332_p1, %s1731_s17, %s334_s21  }
   0xc   : > { %p1859_p5 = por %p345_p2, %p344_p0  ;;  %p1863_p6 = por %p351_p4, %p350_p3 }
   0xd   : > { %2123 = sst [smem:[#allocation8_spill]] %s1857_s23  ;;  %p1347_p7 = scmp.ge.s32.totalorder %s1735_s18, 1 }
   0xe   : > { %p418_p8 = scmp.lt.s32.totalorder %s1735_s18, 3 }
  0x10   : > { %p419_p9 = pnand %p1347_p7, %p418_p8 }
  0x11   : > { %v1571_v0 = vld [vmem:[%s2104_s1] sm:$0xff] (!%p419_p9)   ;;  %v1737_v1 = vmov (!%p419_p9), 0   ;;  %v1572_v2 = vld [vmem:[%s2104_s1 + $0x8] sm:$0xff] (!%p419_p9)   ;;  %s1348_s30 = sshll.u32 (!%p419_p9), %s1842_s13, 1  ;;  %v1573_v3 = vld [vmem:[%s2104_s1 + $0x10] sm:$0xff] (!%p419_p9)   ;;  %vm560_vm0 = vcmask (!%p419_p9), 64512  }
  0x12   : > { %422 = sbr.rel (%p419_p9) target bundleno = 1538 (0x602), region = 76  ;;  %568 = vmatprep.subr.bf16.mxu0 (!%p419_p9), %v1737_v1  ;;  %p466_p10 = scmp.lt.s32.totalorder (!%p419_p9), %s1348_s30, 3  ;;  %v1574_v4 = vld [vmem:[%s2104_s1 + $0x18] sm:$0xff] (!%p419_p9)   ;;  %v1575_v6 = vld [vmem:[%s2104_s1 + $0x20] sm:$0xff] (!%p419_p9)   ;;  %v1576_v7 = vld [vmem:[%s2104_s1 + $0x28] sm:$0xff] (!%p419_p9)   ;;  %vm564_vm1 = vcmask (!%p419_p9), 1043456  }
  0x13   : > { %569 = vmatpush1.bf16.msra.mxu0 (!%p419_p9), %v1571_v0  ;;  %v1577_v8 = vld [vmem:[%s2104_s1 + $0x30] sm:$0xff] (!%p419_p9)   ;;  %v1578_v9 = vld [vmem:[%s2104_s1 + $0x38] sm:$0xff] (!%p419_p9)   ;;  %v1579_v10 = vld [vmem:[%s2104_s1 + $0x40] ss:$0 sps:$4 sm:$0xff] (!%p419_p9)   ;;  %v1738_v14 = vmov (!%p419_p9), 0.0   ;;  %vm1739_vm2 = vmmov (!%p419_p9), 0  }
  0x14   : > { %570 = vmatprep.subr.bf16.mxu0 (!%p419_p9), %v1737_v1  ;;  %v566_v11 = vsel (!%p419_p9), %vm564_vm1, %v1579_v10, 0  ;;  %v1583_v13 = vld [vmem:[%s2106_s3] sm:$0xff] (!%p419_p9)   ;;  %1457 = vmatprep.subr.bf16.mxu1 (!%p419_p9), %v1738_v14  ;;  %v1584_v15 = vld [vmem:[%s2106_s3 + $0x8] sm:$0xff] (!%p419_p9)   ;;  %v1585_v16 = vld [vmem:[%s2106_s3 + $0x10] sm:$0xff] (!%p419_p9)   ;;  %vm790_vm3 = vcmask (!%p419_p9), 523264   ;;  %vm988_vm4 = vcmask (!%p419_p9), 261120  }
  0x15   : > { %1458 = vmatpush3.bf16.msra.mxu1 (!%p419_p9), %v1583_v13  ;;  %v1586_v17 = vld [vmem:[%s2106_s3 + $0x18] sm:$0xff] (!%p419_p9)   ;;  %v1587_v18 = vld [vmem:[%s2106_s3 + $0x20] sm:$0xff] (!%p419_p9)   ;;  %v1588_v19 = vld [vmem:[%s2106_s3 + $0x28] sm:$0xff] (!%p419_p9)   ;;  %1473 = vmatprep.mubr.msk.bf16.mxu1 (!%p419_p9), %vm1739_vm2, %v1738_v14  ;;  %s1192_s28 = sld [smem:[#allocation2]] (!%p419_p9)  ;;  %s462_s19 = sand.u32 (!%p419_p9), 1, %s1727_s16   ;;  %vm1263_vm5 = vcmask (!%p419_p9), 11264  }
  0x16   : > { %1459 = vmatprep.subr.bf16.mxu1 (!%p419_p9), %v1738_v14  ;;  %v1589_v20 = vld [vmem:[%s2106_s3 + $0x30] sm:$0xff] (!%p419_p9)   ;;  %v1590_v21 = vld [vmem:[%s2106_s3 + $0x38] sm:$0xff] (!%p419_p9)   ;;  %v1351_v22 = vld [vmem:[%s2105_s2] ss:$0 sm:$0xff] (!%p419_p9)  ;;  %s1526_s21 = smul.u32 (!%p419_p9), 384, %s1842_s13  ;;  %s2062_s13 = scalar_lea.sflag (!%p419_p9), [#allocation4], %s462_s19 }
  0x17   : > { %571 = vmatpush1.bf16.msra.mxu0 (!%p419_p9), %v1572_v2  ;;  %v1591_v40 = vld [vmem:[%s2108_s5] sm:$0xff] (!%p419_p9)   ;;  %v1592_v41 = vld [vmem:[%s2108_s5 + $0x8] sm:$0xff] (!%p419_p9)   ;;  %v1593_v42 = vld [vmem:[%s2108_s5 + $0x10] sm:$0xff] (!%p419_p9)   ;;  %s1740_s29 = smov (!%p419_p9), [#allocation3]  }
  0x18   : > { %572 = vmatprep.subr.bf16.mxu0 (!%p419_p9), %v1737_v1  ;;  %v1594_v43 = vld [vmem:[%s2108_s5 + $0x18] sm:$0xff] (!%p419_p9)   ;;  %v1595_v44 = vld [vmem:[%s2110_s7] sm:$0xff] (!%p419_p9)   ;;  %v1596_v45 = vld [vmem:[%s2110_s7 + $0x8] sm:$0xff] (!%p419_p9)   ;;  %s2058_s27 = scalar_lea.hbm (!%p419_p9), %s2117_s14, %s1526_s21 }
  0x19   : > { %s2133_s30 = smov (!%p466_p10, %s1348_s30), 3  ;;  %1460 = vmatpush3.bf16.msra.mxu1 %v1584_v15  ;;  %v1597_v46 = vld [vmem:[%s2110_s7 + $0x10] sm:$0xff]   ;;  %v1598_v47 = vld [vmem:[%s2110_s7 + $0x18] sm:$0xff]   ;;  %v1366_v48 = vld [vmem:[%s2107_s4] ss:$0 sm:$0xff] }
  0x1a   : > { %s1423_s22 = sshll.u32 %s2133_s30, 3  ;;  %1461 = vmatprep.subr.bf16.mxu1 %v1738_v14  ;;  %s1677_s30 = sshll.u32 %s1740_s29, 4  ;;  %s1678_s30 = int_to_ptr.vmem [resolvable:$false] %s1677_s30 }
  0x1b   : > { %s470_s23 = scalar_lea.vmem %s2103_s0, %s1423_s22  ;;  %573 = vmatpush1.bf16.msra.mxu0 %v1573_v3  ;;  %v1599_v3 = vld [vmem:[%s2110_s7 + $0x20] sm:$0xff]  }
  0x1c   : > { %v1582_v5 = vld [vmem:[%s470_s23 + $0x4] ss:$8 sps:$4 sm:$0xff]   ;;  %574 = vmatprep.subr.bf16.mxu0 %v1737_v1  ;;  %v1580_v12 = vld [vmem:[%s470_s23] ss:$8 sps:$4 sm:$0xff]   ;;  %s1525_s23 = smul.u32 24, %s462_s19 }
  0x1d   : > { %1363 = vmatprep.mubr.msk.bf16.mxu0 %vm560_vm0, %v1582_v5  ;;  %1462 = vmatpush3.bf16.msra.mxu1 %v1585_v16  ;;  %v1601_v5 = vld [vmem:[%s2110_s7 + $0x30] sm:$0xff]  }
  0x1e   : > { %1463 = vmatprep.subr.bf16.mxu1 %v1738_v14  ;;  %s464_s17 = scalar_lea.vmem [#allocation3], %s1525_s23  ;;  %s1679_s23 = scalar_lea.vmem %s1678_s30, 768 }
  0x1f   : > { %575 = vmatpush1.bf16.msra.mxu0 %v1574_v4  ;;  %v1600_v4 = vld [vmem:[%s2110_s7 + $0x28] sm:$0xff]   ;;  %s1282_s20 = sshll.u32 %s464_s17, 4  ;;  %s2053_s20 = int_to_ptr.vmem [resolvable:$true] %s1282_s20 }
  0x20   : > { %576 = vmatprep.subr.bf16.mxu0 %v1737_v1  ;;  %p1680_p0 = scmp.lt.s32.totalorder %s2053_s20, %s1678_s30 }
  0x21   : > { %1464 = vmatpush3.bf16.msra.mxu1 %v1586_v17 }
  0x22   : > { %1465 = vmatprep.subr.bf16.mxu1 %v1738_v14 }
  0x23   : > { %577 = vmatpush1.bf16.msra.mxu0 %v1575_v6  ;;  %v1602_v6 = vld [vmem:[%s2110_s7 + $0x38] sm:$0xff]  }
  0x24   : > { %578 = vmatprep.subr.bf16.mxu0 %v1737_v1 }
  0x25   : > { %1466 = vmatpush3.bf16.msra.mxu1 %v1587_v18  ;;  %v1603_v18 = vld [vmem:[%s2112_s9] sm:$0xff]  }
  0x26   : > { %1467 = vmatprep.subr.bf16.mxu1 %v1738_v14 }
  0x27   : > { %579 = vmatpush1.bf16.msra.mxu0 %v1576_v7  ;;  %v1377_v7 = vld [vmem:[%s2109_s6] ss:$0 sm:$0xff] }
  0x28   : > { %580 = vmatprep.subr.bf16.mxu0 %v1737_v1 }
  0x29   : > { %1468 = vmatpush3.bf16.msra.mxu1 %v1588_v19  ;;  %v1604_v19 = vld [vmem:[%s2112_s9 + $0x8] sm:$0xff]  }
  0x2a   : > { %1469 = vmatprep.subr.bf16.mxu1 %v1738_v14 }
  0x2b   : > { %581 = vmatpush1.bf16.msra.mxu0 %v1577_v8 }
  0x2c   : > { %582 = vmatprep.subr.bf16.mxu0 %v1737_v1 }
  0x2d   : > { %1470 = vmatpush3.bf16.msra.mxu1 %v1589_v20  ;;  %v1383_v20 = vld [vmem:[%s2111_s8] ss:$0 sm:$0xff] }
  0x2e   : > { %1471 = vmatprep.subr.bf16.mxu1 %v1738_v14 }
  0x2f   : > { %583 = vmatpush1.bf16.msra.mxu0 %v1578_v9 }
  0x30   : > { %584 = vmatprep.subr.bf16.mxu0 %v1737_v1 }
  0x31   : > { %1472 = vmatpush3.bf16.msra.mxu1 %v1590_v21 }
  0x32   : > { %1477 = vmatprep.subr.bf16.mxu1 %v1738_v14 }
  0x33   : > { %585 = vmatpush1.bf16.msra.mxu0 %v566_v11 }
  0x34   : > { %1489 = vmatprep.subr.bf16.mxu0 %v1738_v14 }
  0x36   : > { %601 = vmatmul.mubr.bf16.vlgmr.msra.gmra.mrb[0].mxu0 %v1580_v12 }
  0x37   : > { %1505 = vmatprep.mubr.msk.bf16.mxu0 %vm1739_vm2, %v1738_v14  ;;  %1490 = vmatpush3.bf16.msra.mxu0 %v1595_v44 }
  0x38   : > { %1491 = vmatprep.subr.bf16.mxu0 %v1738_v14 }
  0x3b   : > { %1492 = vmatpush3.bf16.msra.mxu0 %v1596_v45 }
  0x3c   : > { %1493 = vmatprep.subr.bf16.mxu0 %v1738_v14 }
  0x3f   : > { %1494 = vmatpush3.bf16.msra.mxu0 %v1597_v46 }
  0x40   : > { %1495 = vmatprep.subr.bf16.mxu0 %v1738_v14 }
  0x43   : > { %1496 = vmatpush3.bf16.msra.mxu0 %v1598_v47 }
  0x44   : > { %1497 = vmatprep.subr.bf16.mxu0 %v1738_v14 }
  0x47   : > { %1498 = vmatpush3.bf16.msra.mxu0 %v1599_v3 }
  0x48   : > { %1499 = vmatprep.subr.bf16.mxu0 %v1738_v14 }
  0x4b   : > { %1500 = vmatpush3.bf16.msra.mxu0 %v1600_v4 }
  0x4c   : > { %1501 = vmatprep.subr.bf16.mxu0 %v1738_v14 }
  0x4f   : > { %1502 = vmatpush3.bf16.msra.mxu0 %v1601_v5 }
  0x50   : > { %1503 = vmatprep.subr.bf16.mxu0 %v1738_v14 }
  0x53   : > { %1504 = vmatpush3.bf16.msra.mxu0 %v1602_v6  ;;  %v1193_v6 = vstv %s1192_s28  ;;  %s1673_s28 = scalar_lea.vmem %s2053_s20, 384 }
  0x54   : > { %p1674_p11 = scmp.ne.s32.totalorder %s2053_s20, %s1673_s28  ;;  %p1681_p1 = scmp.lt.s32.totalorder %s1679_s23, %s1673_s28 }
  0x56   : > { %p1675_p12 = pnand %p1674_p11, %p1859_p5  ;;  %p1682_p2 = por %p1681_p1, %p1680_p0 }
  0x58   : > { %p1676_p13 = pneg %p1675_p12 }
  0x5a   : > { %p1683_p3 = pnand %p1682_p2, %p1676_p13 }
 0x109   : > { %v602_v23 = vpop.f32.mrb[0].mxu0 }
 0x10a   : > { %v603_v24 = vadd.f32 %v1351_v22, %v602_v23  ;;  %v604_v25 = vpop.f32.mrb[1].mxu0 }
 0x10b   : > { %v605_v26 = vpop.f32.mrb[2].mxu0 }
 0x10c   : > { %v1364_v27 = vmul.f32 -1.442695, %v603_v24  ;;  %v606_v28 = vadd.f32 %v1351_v22, %v605_v26  ;;  %v607_v29 = vpop.f32.mrb[3].mxu0 }
 0x10e   : > { %1613 = vpow2.f32 %v1364_v27  ;;  %v1365_v30 = vmul.f32 -1.442695, %v606_v28 }
 0x110   : > { %1615 = vpow2.f32 %v1365_v30 }
 0x118   : > { %v1614_v31 = vpop.eup %1613 }
 0x119   : > { %v615_v32 = vadd.f32 1.0, %v1614_v31 }
 0x11a   : > { %v1616_v33 = vpop.eup %1615 }
 0x11b   : > { %1617 = vrcp.f32 %v615_v32  ;;  %v616_v34 = vadd.f32 1.0, %v1616_v33 }
 0x11d   : > { %1619 = vrcp.f32 %v616_v34 }
 0x125   : > { %v1618_v35 = vpop.eup %1617 }
 0x126   : > { %v621_v37 = vmul.f32 %v1618_v35, %v603_v24 }
 0x127   : > { %v1620_v36 = vpop.eup %1619 }
 0x128   : > { %v622_v38 = vmul.f32 %v1620_v36, %v606_v28 }
 0x12a   : > { %v623_v39 = vpack.c.bf16 %v622_v38, %v621_v37  ;;  %v1607_v38 = vld [vmem:[%s2114_s11 + $0x4] ss:$12 sps:$4 sm:$0xff]  }
 0x12c   : > { %1474 = vmatmul.mubr.bf16.vlgmr.msra.gmra.mrb[0].mxu1 %v623_v39  ;;  %v1605_v39 = vld [vmem:[%s2114_s11] ss:$12 sps:$4 sm:$0xff]  }
 0x12d   : > { %1485 = vmatprep.mubr.msk.bf16.mxu1 %vm1739_vm2, %v1738_v14  ;;  %1478 = vmatpush3.bf16.msra.mxu1 %v1591_v40  ;;  %v1610_v40 = vld [vmem:[%s2114_s11 + $0x1c] ss:$12 sps:$4 sm:$0xff]  }
 0x12e   : > { %1479 = vmatprep.subr.bf16.mxu1 %v1738_v14 }
 0x131   : > { %1480 = vmatpush3.bf16.msra.mxu1 %v1592_v41  ;;  %v1608_v41 = vld [vmem:[%s2114_s11 + $0x18] ss:$12 sps:$4 sm:$0xff]  }
 0x132   : > { %1481 = vmatprep.subr.bf16.mxu1 %v1738_v14 }
 0x135   : > { %1482 = vmatpush3.bf16.msra.mxu1 %v1593_v42 }
 0x136   : > { %1483 = vmatprep.subr.bf16.mxu1 %v1738_v14 }
 0x139   : > { %1484 = vmatpush3.bf16.msra.mxu1 %v1594_v43 }
 0x13a   : > { %1509 = vmatprep.subr.bf16.mxu1 %v1738_v14 }
 0x1ff   : > { %v729_v49 = vpop.f32.mrb[0].mxu1 }
 0x200   : > { %v730_v50 = vadd.f32 %v1366_v48, %v729_v49  ;;  %v1475_v51 = vpop.f32.mrb[1].mxu1 }
 0x201   : > { %v732_v52 = vpop.f32.mrb[2].mxu1 }
 0x202   : > { %v1375_v53 = vmul.f32 -1.442695, %v730_v50  ;;  %v733_v54 = vadd.f32 %v1366_v48, %v732_v52  ;;  %v1476_v55 = vpop.f32.mrb[3].mxu1 }
 0x204   : > { %1621 = vpow2.f32 %v1375_v53  ;;  %v1376_v56 = vmul.f32 -1.442695, %v733_v54 }
 0x206   : > { %1623 = vpow2.f32 %v1376_v56 }
 0x20e   : > { %v1622_v57 = vpop.eup %1621 }
 0x20f   : > { %v742_v58 = vadd.f32 1.0, %v1622_v57 }
 0x210   : > { %v1624_v59 = vpop.eup %1623 }
 0x211   : > { %1625 = vrcp.f32 %v742_v58  ;;  %v743_v60 = vadd.f32 1.0, %v1624_v59  ;;  %v1611_v58 = vld [vmem:[%s2114_s11 + $0x8] ss:$12 sps:$4 sm:$0xff]  }
 0x213   : > { %1627 = vrcp.f32 %v743_v60  ;;  %v1612_v60 = vld [vmem:[%s2114_s11 + $0x20] ss:$12 sps:$4 sm:$0xff]  }
 0x21b   : > { %v1626_v61 = vpop.eup %1625 }
 0x21c   : > { %v748_v63 = vmul.f32 %v1626_v61, %v730_v50  ;;  %v1058_v61 = vlaneseq }
 0x21d   : > { %v1628_v62 = vpop.eup %1627 }
 0x21e   : > { %v749_v0 = vmul.f32 %v1628_v62, %v733_v54  ;;  %v1059_v62 = vshrl.u32 %v1058_v61, 7 }
 0x220   : > { %v750_v2 = vpack.c.bf16 %v749_v0, %v748_v63  ;;  %v1060_v63 = vsub.s32 0, %v1059_v62  ;;  %v1056_v0 = vld [vmem:[%s2115_s12] sm:$0x7] }
 0x222   : > { %1486 = vmatmul.mubr.msk.bf16.vlgmr.msra.gmra.mrb[4].mxu1 %vm790_vm3, %v750_v2  ;;  %v1064_v2 = vsub.s32 1, %v1059_v62  ;;  %v1061_v3 = vrot.slane %v1056_v0, %v1060_v63 }
 0x223   : > { %1513 = vmatprep.mubr.msk.bf16.mxu1 %vm1739_vm2, %v1738_v14  ;;  %1510 = vmatpush3.bf16.msra.mxu1 %v1603_v18 }
 0x224   : > { %1511 = vmatprep.subr.bf16.mxu1 %v1738_v14  ;;  %v1065_v4 = vrot.slane %v1056_v0, %v1064_v2 }
 0x227   : > { %1512 = vmatpush3.bf16.msra.mxu1 %v1604_v19 }
 0x228   : > { %1108 = vmatprep.subr.bf16.mxu1 %v1607_v38 }
 0x2f5   : > { %v828_v8 = vpop.f32.mrb[4].mxu1 }
 0x2f6   : > { %v829_v9 = vadd.f32 %v1377_v7, %v828_v8  ;;  %v1487_v10 = vpop.f32.mrb[5].mxu1 }
 0x2f7   : > { %v831_v11 = vpop.f32.mrb[6].mxu1 }
 0x2f8   : > { %v832_v12 = vadd.f32 %v1377_v7, %v831_v11  ;;  %v1488_v13 = vpop.f32.mrb[7].mxu1  ;;  %1629 = vtanh.f32 %v829_v9  ;;  %v1068_v9 = vsub.s32 2, %v1059_v62 }
 0x2fa   : > { %1631 = vtanh.f32 %v832_v12  ;;  %v1069_v19 = vrot.slane %v1056_v0, %v1068_v9 }
 0x302   : > { %v1630_v15 = vpop.eup %1629 }
 0x304   : > { %v1632_v16 = vpop.eup %1631 }
 0x305   : > { %v837_v17 = vpack.c.bf16 %v1632_v16, %v1630_v15 }
 0x307   : > { %1506 = vmatmul.mubr.bf16.vlgmr.msra.gmra.mrb[4].mxu0 %v837_v17 }
 0x3da   : > { %v943_v21 = vpop.f32.mrb[4].mxu0 }
 0x3db   : > { %v944_v22 = vadd.f32 %v1383_v20, %v943_v21  ;;  %v1507_v23 = vpop.f32.mrb[5].mxu0 }
 0x3dc   : > { %v946_v24 = vpop.f32.mrb[6].mxu0 }
 0x3dd   : > { %v1392_v25 = vmul.f32 -1.442695, %v944_v22  ;;  %v947_v26 = vadd.f32 %v1383_v20, %v946_v24  ;;  %v1508_v27 = vpop.f32.mrb[7].mxu0 }
 0x3df   : > { %1633 = vpow2.f32 %v1392_v25  ;;  %v1393_v28 = vmul.f32 -1.442695, %v947_v26 }
 0x3e1   : > { %1635 = vpow2.f32 %v1393_v28 }
 0x3e9   : > { %v1634_v29 = vpop.eup %1633 }
 0x3ea   : > { %v956_v30 = vadd.f32 1.0, %v1634_v29 }
 0x3eb   : > { %v1636_v31 = vpop.eup %1635 }
 0x3ec   : > { %1637 = vrcp.f32 %v956_v30  ;;  %v957_v32 = vadd.f32 1.0, %v1636_v31 }
 0x3ee   : > { %1639 = vrcp.f32 %v957_v32 }
 0x3f6   : > { %v1638_v33 = vpop.eup %1637 }
 0x3f7   : > { %v962_v35 = vmul.f32 %v1638_v33, %v944_v22 }
 0x3f8   : > { %v1640_v34 = vpop.eup %1639 }
 0x3f9   : > { %v963_v36 = vmul.f32 %v1640_v34, %v947_v26 }
 0x3fb   : > { %v964_v37 = vpack.c.bf16 %v963_v36, %v962_v35 }
 0x3fd   : > { %1514 = vmatmul.mubr.msk.bf16.vlgmr.msra.gmra.mrb[8].mxu1 %vm988_vm4, %v964_v37 }
 0x3fe   : > { %1140 = vmatprep.mubr.bf16.mxu1 %v1737_v1  ;;  %1109 = vmatpush1.bf16.msra.mxu1 %v1605_v39  ;;  %v1394_v1 = vld [vmem:[%s2113_s10] ss:$0 sm:$0xff] }
 0x3ff   : > { %1110 = vmatprep.subr.bf16.mxu1 %v1610_v40 }
 0x402   : > { %1111 = vmatpush1.bf16.msra.mxu1 %v1608_v41 }
 0x403   : > { %1517 = vmatprep.subr.bf16.mxu1 %v1738_v14 }
 0x4d0   : > { %v1026_v42 = vpop.f32.mrb[8].mxu1 }
 0x4d1   : > { %v1027_v43 = vadd.f32 %v1394_v1, %v1026_v42  ;;  %v1515_v44 = vpop.f32.mrb[9].mxu1 }
 0x4d2   : > { %v1029_v45 = vpop.f32.mrb[10].mxu1 }
 0x4d3   : > { %v1398_v46 = vmul.f32 -1.442695, %v1027_v43  ;;  %v1030_v47 = vadd.f32 %v1394_v1, %v1029_v45  ;;  %v1516_v48 = vpop.f32.mrb[11].mxu1 }
 0x4d5   : > { %1641 = vpow2.f32 %v1398_v46  ;;  %v1399_v49 = vmul.f32 -1.442695, %v1030_v47 }
 0x4d7   : > { %1643 = vpow2.f32 %v1399_v49 }
 0x4df   : > { %v1642_v50 = vpop.eup %1641 }
 0x4e0   : > { %v1039_v51 = vadd.f32 1.0, %v1642_v50 }
 0x4e1   : > { %v1644_v52 = vpop.eup %1643 }
 0x4e2   : > { %1645 = vrcp.f32 %v1039_v51  ;;  %v1040_v53 = vadd.f32 1.0, %v1644_v52 }
 0x4e4   : > { %1647 = vrcp.f32 %v1040_v53 }
 0x4ec   : > { %v1646_v54 = vpop.eup %1645 }
 0x4ed   : > { %v1045_v56 = vmul.f32 %v1646_v54, %v1027_v43 }
 0x4ee   : > { %v1648_v55 = vpop.eup %1647 }
 0x4ef   : > { %v1046_v57 = vmul.f32 %v1648_v55, %v1030_v47 }
 0x4f1   : > { %v1047_v59 = vpack.c.bf16 %v1046_v57, %v1045_v56 }
 0x4f3   : > { %1406 = vmatmul.mubr.msk.bf16.vlgmr.msra.gmra.mrb[12].mxu1 %vm988_vm4, %v1047_v59 }
 0x4f4   : > { %1518 = vmatpush3.bf16.msra.mxu1 %v1611_v58  ;;  %1521 = vmatprep.mubr.msk.bf16.mxu1 %vm1739_vm2, %v1738_v14 }
 0x4f5   : > { %1519 = vmatprep.subr.bf16.mxu1 %v1738_v14 }
 0x4f8   : > { %1520 = vmatpush3.bf16.msra.mxu1 %v1612_v60 }
 0x4fb   : > { %1522 = vmatmul.mubr.msk.bf16.vlgmr.msra.gmra.mrb[16].mxu1 %vm988_vm4, %v1047_v59 }
 0x5c6   : > { %v1142_v5 = vpop.f32.mrb[12].mxu1 }
 0x5c7   : > { %v1143_v7 = vadd.f32 %v1142_v5, %v1061_v3  ;;  %v1144_v8 = vpop.f32.mrb[13].mxu1 }
 0x5c8   : > { %v1145_v14 = vadd.f32 %v1144_v8, %v1065_v4  ;;  %v1146_v10 = vpop.f32.mrb[14].mxu1 }
 0x5c9   : > { %v1194_v11 = vmul.f32 %v1193_v6, %v1143_v7  ;;  %v1147_v12 = vadd.f32 %v1146_v10, %v1061_v3  ;;  %v1148_v13 = vpop.f32.mrb[15].mxu1 }
 0x5ca   : > { %v1195_v15 = vmul.f32 %v1193_v6, %v1145_v14  ;;  %v1149_v16 = vadd.f32 %v1148_v13, %v1065_v4 }
 0x5cb   : > { %v1408_v17 = vmul.f32 -1.442695, %v1194_v11  ;;  %v1197_v18 = vmul.f32 %v1193_v6, %v1147_v12 }
 0x5cc   : > { %v1409_v20 = vmul.f32 -1.442695, %v1195_v15  ;;  %v1198_v21 = vmul.f32 %v1193_v6, %v1149_v16 }
 0x5cd   : > { %1649 = vpow2.f32 %v1408_v17  ;;  %v1411_v22 = vmul.f32 -1.442695, %v1197_v18 }
 0x5ce   : > { %1651 = vpow2.f32 %v1409_v20  ;;  %v1412_v23 = vmul.f32 -1.442695, %v1198_v21  ;;  %v1185_v24 = vpop.f32.mrb[16].mxu1 }
 0x5cf   : > { %1653 = vpow2.f32 %v1411_v22  ;;  %v1186_v25 = vadd.f32 %v1185_v24, %v1069_v19  ;;  %v1523_v26 = vpop.f32.mrb[17].mxu1 }
 0x5d0   : > { %1655 = vpow2.f32 %v1412_v23  ;;  %v1188_v27 = vpop.f32.mrb[18].mxu1 }
 0x5d1   : > { %v1196_v28 = vmul.f32 %v1193_v6, %v1186_v25  ;;  %v1189_v29 = vadd.f32 %v1188_v27, %v1069_v19  ;;  %v1524_v30 = vpop.f32.mrb[19].mxu1 }
 0x5d3   : > { %v1410_v31 = vmul.f32 -1.442695, %v1196_v28  ;;  %v1199_v32 = vmul.f32 %v1193_v6, %v1189_v29 }
 0x5d5   : > { %1657 = vpow2.f32 %v1410_v31  ;;  %v1413_v33 = vmul.f32 -1.442695, %v1199_v32 }
 0x5d7   : > { %v1650_v34 = vpop.eup %1649  ;;  %1659 = vpow2.f32 %v1413_v33 }
 0x5d8   : > { %v1652_v35 = vpop.eup %1651  ;;  %v1218_v36 = vadd.f32 1.0, %v1650_v34 }
 0x5d9   : > { %v1654_v37 = vpop.eup %1653  ;;  %v1219_v38 = vadd.f32 1.0, %v1652_v35 }
 0x5da   : > { %v1656_v39 = vpop.eup %1655  ;;  %1661 = vrcp.f32 %v1218_v36  ;;  %v1221_v40 = vadd.f32 1.0, %v1654_v37 }
 0x5db   : > { %1663 = vrcp.f32 %v1219_v38  ;;  %v1222_v41 = vadd.f32 1.0, %v1656_v39 }
 0x5dc   : > { %1665 = vrcp.f32 %v1221_v40 }
 0x5dd   : > { %1667 = vrcp.f32 %v1222_v41 }
 0x5df   : > { %v1658_v1 = vpop.eup %1657 }
 0x5e0   : > { %v1220_v42 = vadd.f32 1.0, %v1658_v1 }
 0x5e1   : > { %v1660_v43 = vpop.eup %1659 }
 0x5e2   : > { %1669 = vrcp.f32 %v1220_v42  ;;  %v1223_v44 = vadd.f32 1.0, %v1660_v43 }
 0x5e4   : > { %v1662_v45 = vpop.eup %1661  ;;  %1671 = vrcp.f32 %v1223_v44 }
 0x5e5   : > { %v1664_v46 = vpop.eup %1663  ;;  %v1236_v47 = vmul.f32 %v1662_v45, %v1143_v7 }
 0x5e6   : > { %v1666_v48 = vpop.eup %1665  ;;  %v1237_v49 = vmul.f32 %v1664_v46, %v1145_v14 }
 0x5e7   : > { %v1668_v50 = vpop.eup %1667  ;;  %v1239_v51 = vmul.f32 %v1666_v48, %v1147_v12 }
 0x5e8   : > { %v1424_v52 = vpack.c.bf16 %v1237_v49, %v1236_v47  ;;  %v1240_v53 = vmul.f32 %v1668_v50, %v1149_v16 }
 0x5ea   : > { %1262 = vst [vmem:[%s464_s17] sm:$0xff] %v1424_v52  ;;  %v1426_v54 = vpack.c.bf16 %v1240_v53, %v1239_v51 }
 0x5ec   : > { %v1670_v55 = vpop.eup %1669  ;;  %1265 = vst [vmem:[%s464_s17 + $0xc] sm:$0xff] %v1426_v54 }
 0x5ed   : > { %v1238_v56 = vmul.f32 %v1670_v55, %v1186_v25 }
 0x5ee   : > { %v1672_v57 = vpop.eup %1671 }
 0x5ef   : > { %v1425_v58 = vpack.c.bf16 %v1238_v56, %v1238_v56  ;;  %v1241_v59 = vmul.f32 %v1672_v57, %v1189_v29 }
 0x5f1   : > { %1264 = vst.msk [vmem:[%s464_s17 + $0x8] sm:$0xf] %vm1263_vm5, %v1425_v58  ;;  %v1427_v60 = vpack.c.bf16 %v1241_v59, %v1241_v59 }
 0x5f3   : > { %1266 = vst.msk [vmem:[%s464_s17 + $0x14] sm:$0xf] %vm1263_vm5, %v1427_v60 }
 0x5f4   : > { %1686 = shalt.err (!%p1683_p3)
}
 0x5f5   : > { %s1687_s19 = scalar_lea.hbm %s2058_s27, 384  ;;  %s1691_s22 = scalar_lea.hbm %s2117_s14, 768 }
 0x5f6   : > { %p1688_p4 = scmp.ne.s32.totalorder %s2058_s27, %s1687_s19  ;;  %p1692_p9 = scmp.lt.u32.totalorder %s2058_s27, %s2117_s14 }
 0x5f7   : > { %p1693_p10 = scmp.lt.u32.totalorder %s1691_s22, %s1687_s19  ;;  %p1695_p12 = scmp.lt.u32.totalorder %s1687_s19, %s2058_s27 }
 0x5f8   : > { %p1689_p7 = pnand %p1688_p4, %p1859_p5 }
 0x5f9   : > { %p1694_p11 = por %p1693_p10, %p1692_p9 }
 0x5fa   : > { %p1690_p8 = pneg %p1689_p7 }
 0x5fb   : > { %p1696_p13 = por %p1695_p12, %p1694_p11 }
 0x5fd   : > { %p1697_p0 = pnand %p1696_p13, %p1690_p8 }
 0x5ff   : > { %1700 = shalt.err (!%p1697_p0)
}
 0x600   : > { %s1741_s28 = smov 192   ;;  %s1742_s30 = smov 12  }
 0x601   : > { %1527 = dma.vmem_to_hbm [thread:$0]  (%p1859_p5), %s2053_s20, 384, %s2058_s27, %s2062_s13, %s1741_s28, %s1741_s28, %s1742_s30  }
 0x602 PF: > { %p1533_p1 = scmp.ge.s32.totalorder %s1735_s18, 2  ;;  %s1297_s23 = sand.u32 1, %s1723_s15  }
 0x603   : > { %s1298_s19 = scalar_lea.sflag [#allocation4], %s1297_s23 }
 0x604   : > { %p1530_p2 = pnand %p1533_p1, %p1863_p6 }
 0x606   : > { %1718 = dma.done.wait (!%p1530_p2), %s1298_s19, 384  }
 0x607   : > { %1720 = vsyncadd (!%p1530_p2), %s1298_s19, 4294966912  ;;  %s2126_s18 = sld [smem:[#allocation7_spill]]  ;;  %s2127_s17 = sld [smem:[#allocation6_spill]] }
 0x608   : > { %s2128_s21 = sld [smem:[#allocation8_spill]]  ;;  %s2129_s15 = smov %s1727_s16 }
 0x60d   : > { %p25_p3 = scmp.ge.s32.totalorder %s2126_s18, 4   ;;  %s2130_s16 = smov %s2127_s17 }
 0x60e   : > { %s2131_s17 = smov %s2128_s21 }
 0x60f   :  { %27 = sbr.rel (!%p25_p3) target bundleno = 5 (0x5), region = 111 }
 0x616   :  { %1303 = vsyncpa [#allocation4], 1 }
 0x617   :  { %1305 = vsyncpa [#allocation4 + $0x1], 1 }

</bundles_post_ra>
